<compile_context>
chip_gen: v7x
topology: tpu7x:2x2x1
jax: 0.10.0
libtpu: 0.0.40
codegen_flags: <defaults>
</compile_context>

<pallas_src>
import functools

import jax
import jax.numpy as jnp
from jax.experimental import pallas as pl
from jax.experimental.pallas import tpu as pltpu


# ---------------------------------------------------------------------------
# Kernels
# ---------------------------------------------------------------------------

def _kernel_stride1(x_ref, xh_ref, w1_ref, w3_ref, hp_ref, b3_ref, o_ref, *, add_residual):
    """1x1 expand -> dw(k=3, s=1) -> 1x1 project, BN folded, one (Cin, TL) tile."""
    hp = hp_ref[...]                                   # (H, 5) packed [wd0, wd1, wd2, b1, b2]
    wd0, wd1, wd2 = hp[:, 0:1], hp[:, 1:2], hp[:, 2:3]
    b1, b2 = hp[:, 3:4], hp[:, 4:5]
    w1 = w1_ref[...]                                   # (H, Cin) bf16 (BN1 scale folded in)
    x = x_ref[0]                                       # (Cin, TL) bf16

    # 1x1 expand + BN1 + ReLU6  (MXU, f32 accumulation)
    h = jnp.clip(jnp.dot(w1, x, preferred_element_type=jnp.float32) + b1, 0.0, 6.0)

    # Halo columns of h rebuilt in-kernel through the same bf16 MXU path (tiny (H,Cin)@(Cin,2)).
    hh = jnp.clip(jnp.dot(w1, xh_ref[0, 0], preferred_element_type=jnp.float32) + b1, 0.0, 6.0)
    i = pl.program_id(1)
    valid_l = jnp.where(i > 0, 1.0, 0.0)                          # conv zero-pad at index -1
    valid_r = jnp.where(i < pl.num_programs(1) - 1, 1.0, 0.0)     # conv zero-pad at index  L
    hh_l = hh[:, 0:1] * valid_l                                   # (H, 1)
    hh_r = hh[:, 1:2] * valid_r                                   # (H, 1)

    # Depthwise k=3 + BN2 + ReLU6: lane-shifted taps with the halo spliced in directly
    # (no iota / where edge masks, no negative-shift rolls).
    TL = h.shape[1]
    h_l = jnp.concatenate([hh_l, h[:, :TL - 1]], axis=1)          # h[:, j-1]
    h_r = jnp.concatenate([h[:, 1:], hh_r], axis=1)               # h[:, j+1]
    y = jnp.clip(wd0 * h_l + wd1 * h + wd2 * h_r + b2, 0.0, 6.0)

    # 1x1 project + BN3 (+ residual)
    out = jnp.dot(w3_ref[...], y.astype(w1.dtype), preferred_element_type=jnp.float32)
    out = out + b3_ref[...]
    if add_residual:                                              # stride==1 and Cin==Cout
        out = out + x.astype(jnp.float32)
    o_ref[0] = out.astype(o_ref.dtype)                            # lane-dense store along L


def _kernel_stride2(xc_ref, xr_ref, xh_ref, w1_ref, w3_ref, hp_ref, b3_ref, o_ref, *, mask_last):
    """Polyphase stride-2 variant: depthwise/BN2/ReLU6/project only at strided output positions."""
    hp = hp_ref[...]
    wd0, wd1, wd2 = hp[:, 0:1], hp[:, 1:2], hp[:, 2:3]
    b1, b2 = hp[:, 3:4], hp[:, 4:5]
    w1 = w1_ref[...]

    def expand(xp):                                               # 1x1 expand + BN1 + ReLU6
        return jnp.clip(jnp.dot(w1, xp, preferred_element_type=jnp.float32) + b1, 0.0, 6.0)

    h_c = expand(xc_ref[0])                                       # h at x index 2j    -> (H, TLo)
    h_r = expand(xr_ref[0])                                       # h at x index 2j+1  -> (H, TLo)

    # Left halo h[2*tile_start - 1], rebuilt in-kernel; zero on tile 0 (conv zero-pad).
    i = pl.program_id(1)
    hh_l = expand(xh_ref[0, 0]) * jnp.where(i > 0, 1.0, 0.0)      # (H, 1)

    TLo = h_c.shape[1]
    if mask_last:
        # Odd L only: the right tap of the global last output column is the conv zero-pad.
        # Single keep-mask multiply, active only on the last grid step via a scalar flag.
        last = jnp.where(i == pl.num_programs(1) - 1, 1.0, 0.0)
        lane = jax.lax.broadcasted_iota(jnp.int32, (1, TLo), 1)
        keep = 1.0 - jnp.where(lane == TLo - 1, last, 0.0)        # (1, TLo)
        h_r_tap = h_r * keep
    else:
        h_r_tap = h_r

    # Left tap h[2j-1] == odd phase shifted right by one, halo spliced at column 0.
    h_l = jnp.concatenate([hh_l, h_r[:, :TLo - 1]], axis=1)
    y = jnp.clip(wd0 * h_l + wd1 * h_c + wd2 * h_r_tap + b2, 0.0, 6.0)

    out = jnp.dot(w3_ref[...], y.astype(w1.dtype), preferred_element_type=jnp.float32)
    out = out + b3_ref[...]
    o_ref[0] = out.astype(o_ref.dtype)


# ---------------------------------------------------------------------------
# Wrapper
# ---------------------------------------------------------------------------

def _pick_lane_tile(n, target):
    """Largest L tile <= target dividing n, preferring multiples of 128 (lane-dense)."""
    if n <= target:
        return n
    for cand in range(target - target % 128, 127, -128):
        if n % cand == 0:
            return cand
    # TODO(synk): ragged n with no 128-multiple divisor <= target: fall back to one L tile.
    return n


def _lane_tile_target(lane_tile, H, Cin, Cout, vmem_limit_bytes):
    """Cap the L tile so live f32 intermediates + pipeline buffers fit ~half the VMEM budget."""
    per_lane = 4 * (6 * H + 3 * Cout + 2 * Cin)        # rough bytes per output lane
    cap = (vmem_limit_bytes // 2) // max(per_lane, 1)
    cap = max(128, (cap // 128) * 128)
    return min(lane_tile, cap)


def linear_bottleneck(x, params, *, stride, t, lane_tile=1024,
                      mxu_dtype=jnp.bfloat16, vmem_limit_bytes=48 * 1024 * 1024):
    """x: (B, Cin, L) float32 (NCL, PyTorch layout). Returns (B, Cout, L_out) in NCL."""
    B, Cin, L = x.shape
    H = Cin * t
    Cout = params['w3'].shape[0]
    assert params['w1'].shape == (H, Cin)
    if stride not in (1, 2):
        raise NotImplementedError("stride >= 3 not implemented")  # TODO(synk)
    L_out = (L - 1) // stride + 1
    add_residual = (stride == 1 and Cin == Cout)
    out_dtype = x.dtype
    eps = 1e-5

    # Fold BatchNorm (inference / running stats) into per-channel scale + bias, then fold the
    # scales into the conv weights so the kernel only adds biases (fewer full-tile VPU passes).
    def fold(g, b, m, v):
        s = g / jnp.sqrt(v + eps)
        return s[:, None], (b - m * s)[:, None]

    s1, b1 = fold(params['g1'], params['b1'], params['m1'], params['v1'])
    s2, b2 = fold(params['g2'], params['b2'], params['m2'], params['v2'])
    s3, b3 = fold(params['g3'], params['b3'], params['m3'], params['v3'])

    w1s = (params['w1'] * s1).astype(mxu_dtype)        # (H, Cin)   MXU operand, BN1 folded
    w3s = (params['w3'] * s3).astype(mxu_dtype)        # (Cout, H)  MXU operand, BN3 folded
    wds = params['wd'] * s2                            # (H, 3)     depthwise taps, BN2 folded
    hpack = jnp.concatenate([wds, b1, b2], axis=1).astype(jnp.float32)   # (H, 5) packed params
    b3 = b3.astype(jnp.float32)                        # (Cout, 1)

    x_s = x.astype(mxu_dtype)                          # bf16 stream: halves HBM->VMEM traffic

    # Lane (length) tile: VMEM-aware, lane-dense, and split so megacore has >= 2 grid steps.
    target = _lane_tile_target(lane_tile, H, Cin, Cout, vmem_limit_bytes)
    TLo = _pick_lane_tile(L_out, target)
    n_lt = L_out // TLo
    if B * n_lt < 2:
        half = _pick_lane_tile(L_out, max(128, TLo // 2))
        if L_out // half >= 2:
            TLo, n_lt = half, L_out // half

    # Invariant weights: constant index_map; kept with default buffering for portability.
    weight_specs = [
        pl.BlockSpec((H, Cin), lambda b, i: (0, 0)),
        pl.BlockSpec((Cout, H), lambda b, i: (0, 0)),
        pl.BlockSpec((H, 5), lambda b, i: (0, 0)),
        pl.BlockSpec((Cout, 1), lambda b, i: (0, 0)),
    ]
    weights = (w1s, w3s, hpack, b3)

    if stride == 1:
        # Halo x columns per tile i: left = i*TL - 1, right = i*TL + TL (clamped; the kernel
        # zeroes the out-of-range ones from program_id -> the conv's zero padding).
        starts = jnp.arange(n_lt, dtype=jnp.int32) * TLo
        li = jnp.clip(starts - 1, 0, L - 1)
        ri = jnp.clip(starts + TLo, 0, L - 1)
        xh = jnp.stack([x_s[:, :, li], x_s[:, :, ri]], axis=-1)           # (B, Cin, n_lt, 2)
        xh = xh.transpose(0, 2, 1, 3)                                     # (B, n_lt, Cin, 2)

        kernel = functools.partial(_kernel_stride1, add_residual=add_residual)
        inputs = (x_s, xh) + weights
        in_specs = [
            pl.BlockSpec((1, Cin, TLo), lambda b, i: (b, 0, i)),
            pl.BlockSpec((1, 1, Cin, 2), lambda b, i: (b, i, 0, 0)),
        ] + weight_specs
    else:  # stride == 2
        xc = x_s[:, :, 0::2]                          # taps at 2j    -> (B, Cin, L_out)
        xr = x_s[:, :, 1::2]                          # taps at 2j+1
        if xr.shape[-1] < L_out:                      # odd L: last right tap is the zero-pad
            xr = jnp.pad(xr, ((0, 0), (0, 0), (0, L_out - xr.shape[-1])))
        # Halo x column per tile i: x[2*i*TLo - 1] (clamped; zeroed in-kernel for i == 0).
        starts = jnp.arange(n_lt, dtype=jnp.int32) * TLo
        li = jnp.clip(2 * starts - 1, 0, L - 1)
        xh = x_s[:, :, li].transpose(0, 2, 1)[..., None]                  # (B, n_lt, Cin, 1)

        kernel = functools.partial(_kernel_stride2, mask_last=(L % 2 == 1))
        inputs = (xc, xr, xh) + weights
        in_specs = [
            pl.BlockSpec((1, Cin, TLo), lambda b, i: (b, 0, i)),
            pl.BlockSpec((1, Cin, TLo), lambda b, i: (b, 0, i)),
            pl.BlockSpec((1, 1, Cin, 1), lambda b, i: (b, i, 0, 0)),
        ] + weight_specs

    return pl.pallas_call(
        kernel,
        out_shape=jax.ShapeDtypeStruct((B, Cout, L_out), out_dtype),
        grid=(B, n_lt),
        in_specs=in_specs,
        out_specs=pl.BlockSpec((1, Cout, TLo), lambda b, i: (b, 0, i)),
        compiler_params=pltpu.CompilerParams(
            dimension_semantics=("parallel", "parallel"),
            vmem_limit_bytes=vmem_limit_bytes),
    )(*inputs)


# ---------------------------------------------------------------------------
# Pure-JAX reference + test harness
# ---------------------------------------------------------------------------

def ref_linear_bottleneck(x, p, *, stride, t):
    """Plain-JAX f32 reference (NCL), mirroring the PyTorch forward with eval-mode BN."""
    eps = 1e-5
    hi = jax.lax.Precision.HIGHEST

    def bn(h, g, b, m, v):
        inv = 1.0 / jnp.sqrt(v + eps)
        return (h - m[None, :, None]) * inv[None, :, None] * g[None, :, None] \
            + b[None, :, None]

    relu6 = lambda z: jnp.clip(z, 0.0, 6.0)
    B, Cin, L = x.shape
    H = Cin * t
    Cout = p['w3'].shape[0]

    h = jnp.einsum('hc,bcl->bhl', p['w1'], x, precision=hi)
    h = relu6(bn(h, p['g1'], p['b1'], p['m1'], p['v1']))

    hp = jnp.pad(h, ((0, 0), (0, 0), (1, 1)))
    L_out = (L - 1) // stride + 1
    y = jnp.zeros((B, H, L_out), x.dtype)
    for k in range(3):
        y = y + p['wd'][:, k][None, :, None] \
            * hp[:, :, k:k + stride * (L_out - 1) + 1:stride]
    y = relu6(bn(y, p['g2'], p['b2'], p['m2'], p['v2']))

    out = jnp.einsum('oh,bhl->bol', p['w3'], y, precision=hi)
    out = bn(out, p['g3'], p['b3'], p['m3'], p['v3'])
    if stride == 1 and Cin == Cout:
        out = out + x
    return out


def _make_params(key, Cin, Cout, t):
    H = Cin * t
    ks = jax.random.split(key, 16)
    return {
        # conv weights (PyTorch shapes with the size-1 kernel dim squeezed)
        'w1': jax.random.normal(ks[0], (H, Cin), jnp.float32) * 0.2,     # Conv1d(Cin->H, k=1)
        'wd': jax.random.normal(ks[5], (H, 3), jnp.float32) * 0.3,       # depthwise k=3
        'w3': jax.random.normal(ks[10], (Cout, H), jnp.float32) * 0.2,   # Conv1d(H->Cout, k=1)
        # BatchNorm1d params (gamma, beta, running_mean, running_var)
        'g1': jax.random.uniform(ks[1], (H,), jnp.float32, 0.5, 1.5),
        'b1': jax.random.normal(ks[2], (H,), jnp.float32) * 0.1,
        'm1': jax.random.normal(ks[3], (H,), jnp.float32) * 0.1,
        'v1': jax.random.uniform(ks[4], (H,), jnp.float32, 0.5, 1.5),
        'g2': jax.random.uniform(ks[6], (H,), jnp.float32, 0.5, 1.5),
        'b2': jax.random.normal(ks[7], (H,), jnp.float32) * 0.1,
        'm2': jax.random.normal(ks[8], (H,), jnp.float32) * 0.1,
        'v2': jax.random.uniform(ks[9], (H,), jnp.float32, 0.5, 1.5),
        'g3': jax.random.uniform(ks[11], (Cout,), jnp.float32, 0.5, 1.5),
        'b3': jax.random.normal(ks[12], (Cout,), jnp.float32) * 0.1,
        'm3': jax.random.normal(ks[13], (Cout,), jnp.float32) * 0.1,
        'v3': jax.random.uniform(ks[14], (Cout,), jnp.float32, 0.5, 1.5),
    }


if __name__ == "__main__":
    root = jax.random.PRNGKey(0)
    # (name, B, Cin, Cout, L, stride, lane_tile). Small lane tiles here exist only to exercise
    # the multi-tile + halo paths at toy L; the production default is the adaptive lane_tile.
    cases = [
        ("stride1_residual",    2, 4, 4, 512, 1, 128),   # multi L-tile, residual add
        ("stride2_downsample",  2, 4, 8, 512, 2, 128),   # polyphase stride-2, even L
        ("stride1_nonresidual", 2, 4, 6, 256, 1, 256),   # single tile, Cin != Cout
        ("stride2_odd_length",  1, 4, 8, 511, 2, 128),   # odd L: right-tap zero-pad masking
    ]
    t = 6
    for n, (name, B, Cin, Cout, L, stride, lane_tile) in enumerate(cases):
        kp, kx = jax.random.split(jax.random.fold_in(root, n))
        params = _make_params(kp, Cin, Cout, t)
        x = jax.random.normal(kx, (B, Cin, L), jnp.float32)

        out = jax.block_until_ready(
            linear_bottleneck(x, params, stride=stride, t=t, lane_tile=lane_tile))
        ref = ref_linear_bottleneck(x, params, stride=stride, t=t)

        L_out = (L - 1) // stride + 1
        assert out.shape == ref.shape == (B, Cout, L_out), (name, out.shape)
        # Tolerance: bf16 input stream + bf16 MXU operands with f32 accumulation through two
        # matmuls (BN/ReLU6/depthwise/residual stay f32) -> <= ~1.5% relative error; allow 3%
        # of the reference dynamic range.
        tol = 3e-2 * max(1.0, float(jnp.max(jnp.abs(ref))))
        err = float(jnp.max(jnp.abs(out - ref)))
        assert err < tol, f"{name}: max abs err {err} >= tol {tol}"
    print("KERNEL_OK")
</pallas_src>

<mosaic_0001>
module attributes {stable_mosaic.version = 11 : i64} {
  func.func @_kernel_stride1(%arg0: i32, %arg1: i32, %arg2: memref<1x4x128xbf16, #tpu.memory_space<vmem>>, %arg3: memref<1x1x4x2xbf16, #tpu.memory_space<vmem>>, %arg4: memref<24x4xbf16, #tpu.memory_space<vmem>>, %arg5: memref<4x24xbf16, #tpu.memory_space<vmem>>, %arg6: memref<24x5xf32, #tpu.memory_space<vmem>>, %arg7: memref<4x1xf32, #tpu.memory_space<vmem>>, %arg8: memref<1x4x128xf32, #tpu.memory_space<vmem>>) attributes {dimension_semantics = [#tpu.dimension_semantics<parallel>, #tpu.dimension_semantics<parallel>], iteration_bounds = array<i64: 2, 4>, scalar_prefetch = 0 : i64, scratch_operands = 0 : i64, tpu.core_type = #tpu.core_type<tc>, window_params = [{transform_indices = @transform_0, window_bounds = array<i64: 1, 4, 128>}, {transform_indices = @transform_1, window_bounds = array<i64: 1, 1, 4, 2>}, {pipeline_mode = #tpu.pipeline_mode<synchronous>, transform_indices = @transform_2, window_bounds = array<i64: 24, 4>}, {pipeline_mode = #tpu.pipeline_mode<synchronous>, transform_indices = @transform_3, window_bounds = array<i64: 4, 24>}, {pipeline_mode = #tpu.pipeline_mode<synchronous>, transform_indices = @transform_4, window_bounds = array<i64: 24, 5>}, {pipeline_mode = #tpu.pipeline_mode<synchronous>, transform_indices = @transform_5, window_bounds = array<i64: 4, 1>}, {transform_indices = @transform_6, window_bounds = array<i64: 1, 4, 128>}]} {
    %c0 = arith.constant 0 : index
    %c0_0 = arith.constant 0 : index
    %0 = vector.load %arg6[%c0, %c0_0] : memref<24x5xf32, #tpu.memory_space<vmem>>, vector<24x5xf32>
    %1 = vector.extract_strided_slice %0 {offsets = [0, 0], sizes = [24, 1], strides = [1, 1]} : vector<24x5xf32> to vector<24x1xf32>
    %2 = vector.extract_strided_slice %0 {offsets = [0, 1], sizes = [24, 1], strides = [1, 1]} : vector<24x5xf32> to vector<24x1xf32>
    %3 = vector.extract_strided_slice %0 {offsets = [0, 2], sizes = [24, 1], strides = [1, 1]} : vector<24x5xf32> to vector<24x1xf32>
    %4 = vector.extract_strided_slice %0 {offsets = [0, 3], sizes = [24, 1], strides = [1, 1]} : vector<24x5xf32> to vector<24x1xf32>
    %5 = vector.extract_strided_slice %0 {offsets = [0, 4], sizes = [24, 1], strides = [1, 1]} : vector<24x5xf32> to vector<24x1xf32>
    %c0_1 = arith.constant 0 : index
    %c0_2 = arith.constant 0 : index
    %6 = vector.load %arg4[%c0_1, %c0_2] : memref<24x4xbf16, #tpu.memory_space<vmem>>, vector<24x4xbf16>
    %c0_3 = arith.constant 0 : index
    %c0_4 = arith.constant 0 : index
    %c0_5 = arith.constant 0 : index
    %7 = vector.load %arg2[%c0_3, %c0_4, %c0_5] : memref<1x4x128xbf16, #tpu.memory_space<vmem>>, vector<1x4x128xbf16>
    %8 = vector.shape_cast %7 : vector<1x4x128xbf16> to vector<4x128xbf16>
    %cst = arith.constant dense<0.000000e+00> : vector<24x128xf32>
    %9 = tpu.matmul %6, %8, %cst {dimension_numbers = #tpu.dot_dimension_numbers<[1], [0], [0], [1], [0, 0, 1, 1], [], []>} : vector<24x4xbf16>, vector<4x128xbf16>, vector<24x128xf32> -> vector<24x128xf32>
    %10 = vector.broadcast %4 : vector<24x1xf32> to vector<24x128xf32>
    %11 = arith.addf %9, %10 : vector<24x128xf32>
    %cst_6 = arith.constant 0.000000e+00 : f32
    %cst_7 = arith.constant 6.000000e+00 : f32
    %12 = vector.broadcast %cst_6 : f32 to vector<24x128xf32>
    %13 = arith.maximumf %12, %11 : vector<24x128xf32>
    %14 = vector.broadcast %cst_7 : f32 to vector<24x128xf32>
    %15 = arith.minimumf %14, %13 : vector<24x128xf32>
    %c0_8 = arith.constant 0 : index
    %c0_9 = arith.constant 0 : index
    %c0_10 = arith.constant 0 : index
    %c0_11 = arith.constant 0 : index
    %16 = vector.load %arg3[%c0_8, %c0_9, %c0_10, %c0_11] : memref<1x1x4x2xbf16, #tpu.memory_space<vmem>>, vector<1x1x4x2xbf16>
    %17 = vector.shape_cast %16 : vector<1x1x4x2xbf16> to vector<4x2xbf16>
    %cst_12 = arith.constant dense<0.000000e+00> : vector<24x2xf32>
    %18 = tpu.matmul %6, %17, %cst_12 {dimension_numbers = #tpu.dot_dimension_numbers<[1], [0], [0], [1], [0, 0, 1, 1], [], []>} : vector<24x4xbf16>, vector<4x2xbf16>, vector<24x2xf32> -> vector<24x2xf32>
    %19 = vector.broadcast %4 : vector<24x1xf32> to vector<24x2xf32>
    %20 = arith.addf %18, %19 : vector<24x2xf32>
    %cst_13 = arith.constant 0.000000e+00 : f32
    %cst_14 = arith.constant 6.000000e+00 : f32
    %21 = vector.broadcast %cst_13 : f32 to vector<24x2xf32>
    %22 = arith.maximumf %21, %20 : vector<24x2xf32>
    %23 = vector.broadcast %cst_14 : f32 to vector<24x2xf32>
    %24 = arith.minimumf %23, %22 : vector<24x2xf32>
    %c0_i32 = arith.constant 0 : i32
    %25 = arith.cmpi sgt, %arg1, %c0_i32 : i32
    %cst_15 = arith.constant 1.000000e+00 : f32
    %cst_16 = arith.constant 0.000000e+00 : f32
    %26 = arith.select %25, %cst_15, %cst_16 : f32
    %c3_i32 = arith.constant 3 : i32
    %27 = arith.cmpi slt, %arg1, %c3_i32 : i32
    %cst_17 = arith.constant 1.000000e+00 : f32
    %cst_18 = arith.constant 0.000000e+00 : f32
    %28 = arith.select %27, %cst_17, %cst_18 : f32
    %29 = vector.extract_strided_slice %24 {offsets = [0, 0], sizes = [24, 1], strides = [1, 1]} : vector<24x2xf32> to vector<24x1xf32>
    %30 = vector.broadcast %26 : f32 to vector<24x1xf32>
    %31 = arith.mulf %29, %30 : vector<24x1xf32>
    %32 = vector.extract_strided_slice %24 {offsets = [0, 1], sizes = [24, 1], strides = [1, 1]} : vector<24x2xf32> to vector<24x1xf32>
    %33 = vector.broadcast %28 : f32 to vector<24x1xf32>
    %34 = arith.mulf %32, %33 : vector<24x1xf32>
    %35 = vector.extract_strided_slice %15 {offsets = [0, 0], sizes = [24, 127], strides = [1, 1]} : vector<24x128xf32> to vector<24x127xf32>
    %36 = tpu.concatenate %31, %35 in 1 : vector<24x1xf32>, vector<24x127xf32> -> vector<24x128xf32>
    %37 = vector.extract_strided_slice %15 {offsets = [0, 1], sizes = [24, 127], strides = [1, 1]} : vector<24x128xf32> to vector<24x127xf32>
    %38 = tpu.concatenate %37, %34 in 1 : vector<24x127xf32>, vector<24x1xf32> -> vector<24x128xf32>
    %39 = vector.broadcast %1 : vector<24x1xf32> to vector<24x128xf32>
    %40 = arith.mulf %39, %36 : vector<24x128xf32>
    %41 = vector.broadcast %2 : vector<24x1xf32> to vector<24x128xf32>
    %42 = arith.mulf %41, %15 : vector<24x128xf32>
    %43 = arith.addf %40, %42 : vector<24x128xf32>
    %44 = vector.broadcast %3 : vector<24x1xf32> to vector<24x128xf32>
    %45 = arith.mulf %44, %38 : vector<24x128xf32>
    %46 = arith.addf %43, %45 : vector<24x128xf32>
    %47 = vector.broadcast %5 : vector<24x1xf32> to vector<24x128xf32>
    %48 = arith.addf %46, %47 : vector<24x128xf32>
    %cst_19 = arith.constant 0.000000e+00 : f32
    %cst_20 = arith.constant 6.000000e+00 : f32
    %49 = vector.broadcast %cst_19 : f32 to vector<24x128xf32>
    %50 = arith.maximumf %49, %48 : vector<24x128xf32>
    %51 = vector.broadcast %cst_20 : f32 to vector<24x128xf32>
    %52 = arith.minimumf %51, %50 : vector<24x128xf32>
    %c0_21 = arith.constant 0 : index
    %c0_22 = arith.constant 0 : index
    %53 = vector.load %arg5[%c0_21, %c0_22] : memref<4x24xbf16, #tpu.memory_space<vmem>>, vector<4x24xbf16>
    %54 = arith.truncf %52 : vector<24x128xf32> to vector<24x128xbf16>
    %cst_23 = arith.constant dense<0.000000e+00> : vector<4x128xf32>
    %55 = tpu.matmul %53, %54, %cst_23 {dimension_numbers = #tpu.dot_dimension_numbers<[1], [0], [0], [1], [0, 0, 1, 1], [], []>} : vector<4x24xbf16>, vector<24x128xbf16>, vector<4x128xf32> -> vector<4x128xf32>
    %c0_24 = arith.constant 0 : index
    %c0_25 = arith.constant 0 : index
    %56 = vector.load %arg7[%c0_24, %c0_25] : memref<4x1xf32, #tpu.memory_space<vmem>>, vector<4x1xf32>
    %57 = vector.broadcast %56 : vector<4x1xf32> to vector<4x128xf32>
    %58 = arith.addf %55, %57 : vector<4x128xf32>
    %59 = arith.extf %8 : vector<4x128xbf16> to vector<4x128xf32>
    %60 = arith.addf %58, %59 : vector<4x128xf32>
    %c0_26 = arith.constant 0 : index
    %c0_27 = arith.constant 0 : index
    %c0_28 = arith.constant 0 : index
    %61 = vector.load %arg8[%c0_26, %c0_27, %c0_28] : memref<1x4x128xf32, #tpu.memory_space<vmem>>, vector<1x4x128xf32>
    %62 = vector.shape_cast %61 : vector<1x4x128xf32> to vector<4x128xf32>
    %63 = vector.shape_cast %60 : vector<4x128xf32> to vector<1x4x128xf32>
    tpu.vector_store %arg8[%c0_26, %c0_27, %c0_28], %63 {strides = array<i32>} : memref<1x4x128xf32, #tpu.memory_space<vmem>>, vector<1x4x128xf32>,
    return
  }
  func.func @transform_0(%arg0: i32, %arg1: i32) -> (i32, i32, i32) {
    %c0_i32 = arith.constant 0 : i32
    %c0_i32_0 = arith.constant 0 : i32
    return %arg0, %c0_i32, %arg1 : i32, i32, i32
  }
  func.func @transform_1(%arg0: i32, %arg1: i32) -> (i32, i32, i32, i32) {
    %c0_i32 = arith.constant 0 : i32
    %c0_i32_0 = arith.constant 0 : i32
    %c0_i32_1 = arith.constant 0 : i32
    return %arg0, %arg1, %c0_i32, %c0_i32_0 : i32, i32, i32, i32
  }
  func.func @transform_2(%arg0: i32, %arg1: i32) -> (i32, i32) {
    %c0_i32 = arith.constant 0 : i32
    %c0_i32_0 = arith.constant 0 : i32
    %c0_i32_1 = arith.constant 0 : i32
    return %c0_i32, %c0_i32_0 : i32, i32
  }
  func.func @transform_3(%arg0: i32, %arg1: i32) -> (i32, i32) {
    %c0_i32 = arith.constant 0 : i32
    %c0_i32_0 = arith.constant 0 : i32
    %c0_i32_1 = arith.constant 0 : i32
    return %c0_i32, %c0_i32_0 : i32, i32
  }
  func.func @transform_4(%arg0: i32, %arg1: i32) -> (i32, i32) {
    %c0_i32 = arith.constant 0 : i32
    %c0_i32_0 = arith.constant 0 : i32
    %c0_i32_1 = arith.constant 0 : i32
    return %c0_i32, %c0_i32_0 : i32, i32
  }
  func.func @transform_5(%arg0: i32, %arg1: i32) -> (i32, i32) {
    %c0_i32 = arith.constant 0 : i32
    %c0_i32_0 = arith.constant 0 : i32
    %c0_i32_1 = arith.constant 0 : i32
    return %c0_i32, %c0_i32_0 : i32, i32
  }
  func.func @transform_6(%arg0: i32, %arg1: i32) -> (i32, i32, i32) {
    %c0_i32 = arith.constant 0 : i32
    %c0_i32_0 = arith.constant 0 : i32
    return %arg0, %c0_i32, %arg1 : i32, i32, i32
  }
}

</mosaic_0001>

<bundles_post_ra>
// kernel: tpu_custom_call.1
= control target key start
LH: loop header
LB: loop body
LE: loop exit
PB: predicated region body
PF: predicated region fallthrough
CT: control target
= control target key end

     0   :  { %11 = vsyncpa [#allocation3], 0  ;;  %s1225_s0 = inlined_call_operand.vmem [shape: bf16[2,4,512], index: 0, kind: input, shape index: {}]   ;;  %s1226_s1 = inlined_call_operand.vmem [shape: bf16[2,4,4,2], index: 1, kind: input, shape index: {}]   ;;  %s1227_s2 = inlined_call_operand.vmem [shape: bf16[24,4], index: 2, kind: input, shape index: {}]   ;;  %s1228_s3 = inlined_call_operand.vmem [shape: bf16[4,24], index: 3, kind: input, shape index: {}]   ;;  %s1229_s4 = inlined_call_operand.vmem [shape: f32[24,5], index: 4, kind: input, shape index: {}]   ;;  %s1230_s5 = inlined_call_operand.vmem [shape: f32[4,1], index: 5, kind: input, shape index: {}]   ;;  %s1231_s6 = inlined_call_operand.hbm [shape: f32[2,4,512], index: 6, kind: output, shape index: {}]  }
   0x1   :  { %13 = vsyncpa [#allocation3 + $0x1], 0  ;;  %s1047_s21 = smov 0   ;;  %s1049_s22 = smov 0  }
   0x2   :  { %s1051_s23 = smov 0   ;;  %s1053_s24 = smov 0  }
   0x3   :  { %s1055_s25 = smov 0   ;;  %s1057_s26 = smov 0  }
   0x4   :  { %s1059_s27 = smov 0   ;;  %s1061_s28 = smov 0  }
   0x5 LB: > { %s757_s29 = sadd.s32 4294967295, %s999_s28   ;;  %s758_s30 = sadd.s32 4294967294, %s999_s28   ;;  %s999_s28 = sphi %s1061_s28, %s19_s28   ;;  %s995_s27 = sphi %s1059_s27, %s1246_s27   ;;  %s991_s26 = sphi %s1057_s26, %s1245_s26   ;;  %s987_s25 = sphi %s1055_s25, %s1244_s25   ;;  %s983_s24 = sphi %s1053_s24, %s1243_s24   ;;  %s979_s23 = sphi %s1051_s23, %s1242_s23   ;;  %s975_s22 = sphi %s1049_s22, %s1241_s22   ;;  %s971_s21 = sphi %s1047_s21, %s1240_s21  }
   0x6   : > { %s28_s7 = sadd.s32 1, %s991_s26  ;;  %s31_s8 = sadd.s32 1, %s995_s27 }
   0x7   : > { %p29_p0 = scmp.ge.s32.totalorder %s28_s7, 4  ;;  %p190_p1 = scmp.ne.s32.totalorder %s979_s23, %s975_s22 }
   0x8   : > { %p191_p2 = scmp.eq.s32.totalorder %s757_s29, 7  ;;  %p196_p5 = scmp.ne.s32.totalorder %s975_s22, %s971_s21 }
   0x9   : > { %s1248_s7 = smov (%p29_p0, %s28_s7), 0  ;;  %s1250_s8 = smov (!%p29_p0, %s31_s8), %s995_s27 }
   0xa   : > { %1234 = sst [smem:[#allocation5_spill]] %s1248_s7  ;;  %s176_s9 = ssub.s32 %s991_s26, %s1248_s7 }
   0xb   : > { %p1098_p3 = por %p191_p2, %p190_p1  ;;  %p33_p4 = scmp.ge.s32.totalorder %s1250_s8, 2 }
   0xc   : > { %p197_p6 = scmp.eq.s32.totalorder %s758_s30, 7  ;;  %p761_p7 = scmp.ge.s32.totalorder %s999_s28, 1 }
   0xd   : > { %s1252_s8 = smov (%p33_p4, %s1250_s8), 0  ;;  %p249_p9 = scmp.lt.s32.totalorder %s999_s28, 9 }
   0xe   : > { %1236 = sst [smem:[#allocation6_spill]] %s1252_s8  ;;  %p1107_p8 = por %p197_p6, %p196_p5 }
   0xf   : > { %s175_s12 = ssub.s32 %s995_s27, %s1252_s8  ;;  %s180_s13 = sadd.s32 1, %s979_s23 }
  0x10   : > { %s177_s14 = sor.u32 %s176_s9, %s175_s12  ;;  %p250_p10 = pnand %p761_p7, %p249_p9 }
  0x11   : > { %p178_p11 = scmp.eq.s32.totalorder %s177_s14, 0  ;;  %p290_p12 = scmp.lt.s32.totalorder (!%p250_p10), %s987_s25, 1  ;;  %v903_v0 = vld [vmem:[%s1227_s2] sm:$0xff] (!%p250_p10)   ;;  %vm337_vm0 = vcmask (!%p250_p10), 31744   ;;  %v309_v2 = vld [vmem:[%s1229_s4 + $0x10] sm:$0xff] (!%p250_p10)  ;;  %v1001_v3 = vmov (!%p250_p10), 3  }
  0x12   : > { %253 = sbr.rel (%p250_p10) target bundleno = 633 (0x279), region = 44  ;;  %p292_p13 = scmp.lt.s32.totalorder (!%p250_p10), %s983_s24, 3  ;;  %790 = vmatprep.mubr.msk.bf16.mxu0 (!%p250_p10), %vm337_vm0, %v903_v0  ;;  %796 = vmatprep.mubr.msk.bf16.mxu1 (!%p250_p10), %vm337_vm0, %v903_v0  ;;  %v307_v1 = vld [vmem:[%s1229_s4] sm:$0xff] (!%p250_p10)  ;;  %v308_v4 = vld [vmem:[%s1229_s4 + $0x8] sm:$0xff] (!%p250_p10)  ;;  %vm344_vm1 = vcmask (!%p250_p10), 1041408   ;;  %v1002_v7 = vmov (!%p250_p10), 0  }
  0x13   : > { %s1116_s15 = scalar_select %p178_p11, %s979_s23, %s180_s13  }
  0x14   : > { %891 = vset.pattern.permute.xlu0 (!%p250_p10), %v1001_v3  ;;  %892 = vset.pattern.permute.xlu1 (!%p250_p10), %v1001_v3  ;;  %v904_v10 = vld [vmem:[%s1227_s2 + $0x8] ss:$0 sps:$4 sm:$0xff] (!%p250_p10)   ;;  %v1003_v11 = vmov (!%p250_p10), 2   ;;  %v1004_v12 = vmov (!%p250_p10), 1   ;;  %v1005_v13 = vmov (!%p250_p10), 4   ;;  %s1006_s8 = smov (!%p250_p10), 1  }
  0x15   : > { %316 = vperm.xlu0 (!%p250_p10), %891, %v307_v1   ;;  %326 = vperm.xlu1 (!%p250_p10), %892, %v309_v2   ;;  %v1009_v44 = vmov (!%p250_p10), 0.0   ;;  %v588_v47 = vld [vmem:[%s1230_s5] sm:$0xf] (!%p250_p10)  ;;  %vm1010_vm2 = vmmov (!%p250_p10), 0   ;;  %p460_p0 = scmp.gt.s32.totalorder (!%p250_p10), %s983_s24, 0  ;;  %vm484_vm3 = vcmask (!%p250_p10), 7168  }
  0x16   : > { %vm509_vm4 = vcmask (!%p250_p10), 1039360   ;;  %vm598_vm5 = vcmask (!%p250_p10), 1043456   ;;  %vm594_vm6 = vcmask (!%p250_p10), 195584  }
  0x19   : > { %s291_s18 = scalar_select %p290_p12, %s987_s25, 1  ;;  %321 = vperm.xlu0 %891, %v308_v4   ;;  %893 = vset.pattern.permute.xlu1 %v1002_v7 }
  0x1a   : > { %s293_s9 = scalar_select %p292_p13, %s983_s24, 3  ;;  %514 = vperm.xlu1 %893, %v307_v1  }
  0x1b   : > { %s763_s12 = sshll.u32 %s291_s18, 2  ;;  %s775_s18 = sshll.u32 %s987_s25, 2 }
  0x1c   : > { %s295_s13 = sadd.s32 %s763_s12, %s293_s9  ;;  %s1007_s12 = smov 127  }
  0x1d   : > { %s764_s17 = sshll.u32 %s295_s13, 1  ;;  %895 = vset.pattern.permute.xlu0 %v1003_v11  ;;  %s1008_s13 = smov 126  }
  0x1e   : > { %s297_s29 = scalar_lea.vmem %s1225_s0, %s764_s17  ;;  %s305_s7 = scalar_lea.vmem %s1226_s1, %s764_s17  ;;  %547 = vperm.xlu0 %895, %v307_v1   ;;  %894 = vset.pattern.permute.xlu1 %v1004_v12 }
  0x1f   : > { %v1144_v5 = vld [vmem:[%s297_s29] sm:$0x3]  ;;  %529 = vperm.xlu1 %894, %v307_v1   ;;  %s461_s17 = scalar_select %p460_p0, 1.0, 0.0 }
  0x20   : > { %v402_v6 = vld [vmem:[%s305_s7] sm:$0x3]  ;;  %808 = vmatprep.subr.msk.bf16.mxu0 %vm344_vm1, %v1144_v5  ;;  %v346_v8 = vsel %vm344_vm1, %v1144_v5, 0  ;;  %s463_s7 = scalar_select %p292_p13, 1.0, 0.0 }
  0x21   : > { %809 = vmatprep.subr.msk.bf16.mxu1 %vm344_vm1, %v402_v6  ;;  %v404_v9 = vsel %vm344_vm1, %v402_v6, 0  ;;  %789 = vmatpush3.bf16.msra.mxu0 %v346_v8  ;;  %v464_v60 = vstv %s461_s17  ;;  %s287_s29 = sand.u32 1, %s975_s22   ;;  %s657_s9 = sadd.s32 %s983_s24, %s775_s18 }
  0x22   : > { %795 = vmatpush3.bf16.msra.mxu1 %v404_v9  ;;  %898 = vset.pattern.permute.xlu0 %v1004_v12  ;;  %v468_v39 = vstv %s463_s7  ;;  %s762_s30 = sshll.u32 %s287_s29, 2  ;;  %s776_s7 = sshll.u32 %s657_s9, 6 }
  0x23   : > { %537 = vperm.xlu0 %898, %v309_v2   ;;  %533 = vperm.xlu1 %894, %v308_v4   ;;  %s1172_s16 = scalar_lea.hbm %s1231_s6, %s776_s7  ;;  %s646_s24 = scalar_lea.sflag [#allocation3], %s287_s29 }
  0x24   : > { %791 = vmatmul.mubr.msk.bf16.vlgmr.msra.gmra.mrb[0].mxu0 %vm337_vm0, %v904_v10  ;;  %800 = vmatprep.subr.bf16.mxu0 %v1009_v44  ;;  %s1011_s17 = smov [#allocation2]  }
  0x25   : > { %797 = vmatmul.mubr.msk.bf16.vlgmr.msra.gmra.mrb[0].mxu1 %vm337_vm0, %v904_v10  ;;  %804 = vmatprep.mubr.msk.bf16.mxu0 %vm1010_vm2, %v1009_v44  ;;  %s909_s19 = sshll.u32 %s1011_s17, 4  ;;  %s910_s19 = int_to_ptr.vmem [resolvable:$false] %s909_s19 }
  0x26   : > { %s911_s20 = scalar_lea.vmem %s910_s19, 128 }
  0x27   : > { %901 = vset.pattern.permute.xlu0 %v1005_v13  ;;  %896 = vset.pattern.permute.xlu1 %v1003_v11 }
  0x28   : > { %569 = vperm.xlu0 %901, %v308_v4   ;;  %551 = vperm.xlu1 %896, %v308_v4  }
  0x2c   : > { %902 = vset.pattern.permute.xlu0 %v1002_v7  ;;  %897 = vset.pattern.permute.xlu1 %v1002_v7 }
  0x2d   : > { %518 = vperm.xlu0 %902, %v308_v4   ;;  %522 = vperm.xlu1 %897, %v309_v2  }
  0x31   : > { %899 = vset.pattern.permute.xlu1 %v1003_v11 }
  0x32   : > { %555 = vperm.xlu1 %899, %v309_v2  }
  0x36   : > { %900 = vset.pattern.permute.xlu1 %v1005_v13 }
  0x37   : > { %565 = vperm.xlu1 %900, %v307_v1  }
  0x3b   : > { %573 = vperm.xlu1 %900, %v309_v2  }
  0x94   : > { %v317_v14 = vpop.permute.xlu0 %316  ;;  %v327_v15 = vpop.permute.xlu1 %326 }
  0x98   : > { %v322_v16 = vpop.permute.xlu0 %321 }
  0x99   : > { %v515_v49 = vpop.permute.xlu1 %514 }
  0x9d   : > { %v548_v53 = vpop.permute.xlu0 %547 }
  0x9e   : > { %v530_v50 = vpop.permute.xlu1 %529 }
  0xa2   : > { %v534_v51 = vpop.permute.xlu1 %533  ;;  %v538_v55 = vpop.permute.xlu0 %537 }
  0xa7   : > { %v552_v52 = vpop.permute.xlu1 %551  ;;  %v570_v57 = vpop.permute.xlu0 %569 }
  0xac   : > { %v523_v54 = vpop.permute.xlu1 %522  ;;  %v519_v59 = vpop.permute.xlu0 %518 }
  0xb1   : > { %v556_v56 = vpop.permute.xlu1 %555 }
  0xb6   : > { %v566_v58 = vpop.permute.xlu1 %565 }
  0xba   : > { %v574_v61 = vpop.permute.xlu1 %573 }
  0xf7   : > { %v792_v17 = vpop.f32.mrb[0].mxu0 }
  0xf8   : > { %v798_v18 = vpop.f32.mrb[0].mxu1  ;;  %v391_v19 = vadd.f32 %v792_v17, %v327_v15  ;;  %v382_v20 = vpop.f32.mrb[1].mxu0 }
  0xf9   : > { %v440_v21 = vpop.f32.mrb[1].mxu1  ;;  %v383_v22 = vadd.f32 %v382_v20, %v317_v14  ;;  %v793_v24 = vpop.f32.mrb[2].mxu0  ;;  %v449_v38 = vadd.f32 %v798_v18, %v327_v15 }
  0xfa   : > { %v441_v23 = vadd.f32 %v440_v21, %v317_v14  ;;  %v799_v25 = vpop.f32.mrb[2].mxu1  ;;  %v398_v26 = vmax.f32 %v391_v19, 0.0  ;;  %v385_v27 = vpop.f32.mrb[3].mxu0 }
  0xfb   : > { %v443_v28 = vpop.f32.mrb[3].mxu1  ;;  %v396_v29 = vmax.f32 %v383_v22, 0.0  ;;  %v386_v30 = vadd.f32 %v385_v27, %v322_v16  ;;  %v456_v42 = vmax.f32 %v449_v38, 0.0 }
  0xfc   : > { %v401_v31 = vmin.f32 %v398_v26, 6.0  ;;  %v454_v32 = vmax.f32 %v441_v23, 0.0  ;;  %v444_v35 = vadd.f32 %v443_v28, %v322_v16 }
  0xfd   : > { %v399_v33 = vmin.f32 %v396_v29, 6.0  ;;  %v397_v34 = vmax.f32 %v386_v30, 0.0  ;;  %v459_v45 = vmin.f32 %v456_v42, 6.0 }
  0xfe   : > { %479 = vrot.lane.b32.xlu0 %v401_v31, %s1006_s8  ;;  %v457_v37 = vmin.f32 %v454_v32, 6.0  ;;  %v455_v40 = vmax.f32 %v444_v35, 0.0  ;;  %v542_v3 = vmul.f32 %v538_v55, %v401_v31 }
  0xff   : > { %v400_v36 = vmin.f32 %v397_v34, 6.0  ;;  %475 = vrot.lane.b32.xlu1 %v399_v33, %s1006_s8  ;;  %v471_v48 = vmul.f32 %v468_v39, %v459_v45  ;;  %v467_v62 = vmul.f32 %v464_v60, %v459_v45  ;;  %v540_v8 = vmul.f32 %v530_v50, %v399_v33  ;;  %v585_v45 = vld [vmem:[%s1228_s3] sm:$0x3] }
 0x100   : > { %v469_v41 = vmul.f32 %v468_v39, %v457_v37  ;;  %v458_v43 = vmin.f32 %v455_v40, 6.0  ;;  %v465_v63 = vmul.f32 %v464_v60, %v457_v37 }
 0x101   : > { %v541_v15 = vmul.f32 %v534_v51, %v400_v36 }
 0x102   : > { %477 = vrot.lane.b32.xlu0 %v400_v36, %s1006_s8  ;;  %v470_v46 = vmul.f32 %v468_v39, %v458_v43  ;;  %v466_v7 = vmul.f32 %v464_v60, %v458_v43  ;;  %s289_s8 = scalar_lea.vmem [#allocation2], %s762_s30 }
 0x103   : > { %488 = vrot.lane.b32.xlu1 %v399_v33, %s1007_s12 }
 0x106   : > { %500 = vrot.lane.b32.xlu0 %v469_v41, %s1008_s13 }
 0x107   : > { %490 = vrot.lane.b32.xlu1 %v400_v36, %s1007_s12 }
 0x10a   : > { %492 = vrot.lane.b32.xlu0 %v401_v31, %s1007_s12  ;;  %s661_s12 = sshll.u32 %s289_s8, 4  ;;  %s1174_s12 = int_to_ptr.vmem [resolvable:$true] %s661_s12 }
 0x10b   : > { %502 = vrot.lane.b32.xlu1 %v470_v46, %s1008_s13  ;;  %v642_v46 = vunpack.c.l.bf16 %v1144_v5  ;;  %s905_s25 = scalar_lea.vmem %s1174_s12, 64  ;;  %p912_p5 = scmp.lt.s32.totalorder %s1174_s12, %s910_s19 }
 0x10c   : > { %p906_p1 = scmp.ne.s32.totalorder %s1174_s12, %s905_s25  ;;  %p913_p6 = scmp.lt.s32.totalorder %s911_s20, %s905_s25 }
 0x10e   : > { %591 = vperm.xlu0 %902, %v588_v47   ;;  %p907_p2 = pnand %p906_p1, %p1098_p3  ;;  %p914_p7 = por %p913_p6, %p912_p5 }
 0x10f   : > { %504 = vrot.lane.b32.xlu1 %v471_v48, %s1008_s13 }
 0x110   : > { %p908_p4 = pneg %p907_p2 }
 0x112   : > { %p915_p9 = pnand %p914_p7, %p908_p4 }
 0x170   : > { %v480_v0 = vpop.permute.xlu0 %479 }
 0x171   : > { %v487_v1 = vsel %vm484_vm3, %v467_v62, %v480_v0  ;;  %v476_v2 = vpop.permute.xlu1 %475 }
 0x172   : > { %v527_v4 = vmul.f32 %v523_v54, %v487_v1  ;;  %v485_v6 = vsel %vm484_vm3, %v465_v63, %v476_v2 }
 0x173   : > { %v525_v9 = vmul.f32 %v515_v49, %v485_v6 }
 0x174   : > { %v545_v10 = vadd.f32 %v542_v3, %v527_v4  ;;  %v478_v11 = vpop.permute.xlu0 %477 }
 0x175   : > { %v543_v12 = vadd.f32 %v540_v8, %v525_v9  ;;  %v486_v13 = vsel %vm484_vm3, %v466_v7, %v478_v11  ;;  %v489_v14 = vpop.permute.xlu1 %488 }
 0x176   : > { %v526_v16 = vmul.f32 %v519_v59, %v486_v13 }
 0x178   : > { %v544_v17 = vadd.f32 %v541_v15, %v526_v16  ;;  %v501_v18 = vpop.permute.xlu0 %500 }
 0x179   : > { %v510_v19 = vsel %vm509_vm4, %v489_v14, %v501_v18  ;;  %v491_v20 = vpop.permute.xlu1 %490 }
 0x17a   : > { %v558_v21 = vmul.f32 %v548_v53, %v510_v19 }
 0x17c   : > { %v561_v22 = vadd.f32 %v558_v21, %v543_v12  ;;  %v493_v27 = vpop.permute.xlu0 %492 }
 0x17d   : > { %v503_v23 = vpop.permute.xlu1 %502 }
 0x17e   : > { %v511_v24 = vsel %vm509_vm4, %v491_v20, %v503_v23  ;;  %v576_v25 = vadd.f32 %v566_v58, %v561_v22 }
 0x17f   : > { %v559_v26 = vmul.f32 %v552_v52, %v511_v24 }
 0x180   : > { %v579_v31 = vmax.f32 %v576_v25, 0.0 }
 0x181   : > { %v562_v28 = vadd.f32 %v559_v26, %v544_v17  ;;  %v505_v29 = vpop.permute.xlu1 %504 }
 0x182   : > { %v512_v30 = vsel %vm509_vm4, %v493_v27, %v505_v29  ;;  %v582_v36 = vmin.f32 %v579_v31, 6.0 }
 0x183   : > { %v577_v32 = vadd.f32 %v570_v57, %v562_v28  ;;  %v560_v33 = vmul.f32 %v556_v56, %v512_v30 }
 0x185   : > { %v580_v34 = vmax.f32 %v577_v32, 0.0  ;;  %v563_v35 = vadd.f32 %v560_v33, %v545_v10 }
 0x187   : > { %v583_v37 = vmin.f32 %v580_v34, 6.0  ;;  %v578_v38 = vadd.f32 %v574_v61, %v563_v35 }
 0x189   : > { %v586_v39 = vpack.c.bf16 %v583_v37, %v582_v36  ;;  %v581_v40 = vmax.f32 %v578_v38, 0.0 }
 0x18b   : > { %801 = vmatpush3.bf16.msra.mxu0 %v586_v39  ;;  %v584_v41 = vmin.f32 %v581_v40, 6.0 }
 0x18c   : > { %802 = vmatprep.subr.bf16.mxu0 %v1009_v44 }
 0x18d   : > { %v587_v42 = vpack.c.bf16 %v584_v41, %v584_v41  ;;  %v592_v47 = vpop.permute.xlu0 %591 }
 0x18f   : > { %v600_v43 = vsel %vm598_vm5, %v587_v42, 0 }
 0x190   : > { %803 = vmatpush3.bf16.msra.mxu0 %v600_v43 }
 0x193   : > { %805 = vmatmul.mubr.msk.bf16.vlgmr.msra.gmra.mrb[4].mxu0 %vm594_vm6, %v585_v45 }
 0x266   : > { %v636_v48 = vpop.f32.mrb[4].mxu0 }
 0x267   : > { %v637_v44 = vadd.f32 %v636_v48, %v592_v47  ;;  %v806_v49 = vpop.f32.mrb[5].mxu0 }
 0x268   : > { %v639_v50 = vpop.f32.mrb[6].mxu0 }
 0x269   : > { %v643_v51 = vadd.f32 %v642_v46, %v637_v44  ;;  %v807_v52 = vpop.f32.mrb[7].mxu0 }
 0x26b   : > { %644 = vst [vmem:[%s289_s8] sm:$0xf] %v643_v51 }
 0x26c   : > { %918 = shalt.err (!%p915_p9)
}
 0x26d   : > { %s919_s29 = scalar_lea.hbm %s1172_s16, 64  ;;  %s923_s9 = scalar_lea.hbm %s1231_s6, 512 }
 0x26e   : > { %p920_p10 = scmp.ne.s32.totalorder %s1172_s16, %s919_s29  ;;  %p924_p13 = scmp.lt.u32.totalorder %s1172_s16, %s1231_s6 }
 0x26f   : > { %p925_p0 = scmp.lt.u32.totalorder %s923_s9, %s919_s29  ;;  %p927_p2 = scmp.lt.u32.totalorder %s919_s29, %s1172_s16 }
 0x270   : > { %p921_p11 = pnand %p920_p10, %p1098_p3 }
 0x271   : > { %p926_p1 = por %p925_p0, %p924_p13 }
 0x272   : > { %p922_p12 = pneg %p921_p11 }
 0x273   : > { %p928_p4 = por %p927_p2, %p926_p1 }
 0x275   : > { %p929_p5 = pnand %p928_p4, %p922_p12 }
 0x277   : > { %932 = shalt.err (!%p929_p5)
}
 0x278   : > { %810 = dma.vmem_to_hbm [thread:$0]  (%p1098_p3), %s1174_s12, 64, %s1172_s16, %s646_s24  }
 0x279 PF: > { %p816_p6 = scmp.ge.s32.totalorder %s999_s28, 2  ;;  %s673_s13 = sand.u32 1, %s971_s21  }
 0x27a   : > { %s674_s14 = scalar_lea.sflag [#allocation3], %s673_s13 }
 0x27b   : > { %p813_p7 = pnand %p816_p6, %p1107_p8 }
 0x27d   : > { %966 = dma.done.wait (!%p813_p7), %s674_s14, 64  }
 0x27e   : > { %968 = vsyncadd (!%p813_p7), %s674_s14, 4294967232  ;;  %s19_s28 = sadd.s32 1, %s999_s28   ;;  %s1238_s10 = sld [smem:[#allocation5_spill]] }
 0x27f   : > { %p16_p9 = scmp.ge.s32.totalorder %s19_s28, 10   ;;  %s1239_s12 = sld [smem:[#allocation6_spill]] }
 0x280   : > { %s1240_s21 = smov %s975_s22  ;;  %s1241_s22 = smov %s979_s23 }
 0x281   : > { %s1242_s23 = smov %s1116_s15  ;;  %s1243_s24 = smov %s991_s26 }
 0x282   : > { %s1244_s25 = smov %s995_s27  ;;  %18 = sbr.rel (!%p16_p9) target bundleno = 5 (0x5), region = 82 }
 0x284   : > { %s1245_s26 = smov %s1238_s10 }
 0x285   : > { %s1246_s27 = smov %s1239_s12 }
 0x289   :  { %679 = vsyncpa [#allocation3], 1 }
 0x28a   :  { %681 = vsyncpa [#allocation3 + $0x1], 1 }

</bundles_post_ra>
